<compile_context>
chip_gen: v5e
topology: v5e:2x2
jax: 0.10.0
libtpu: 0.0.40
codegen_flags: <defaults>
</compile_context>

<pallas_src>
import functools

import numpy as np
import jax
import jax.numpy as jnp
from jax.experimental import pallas as pl
from jax.experimental.pallas import tpu as pltpu


def _round_up(x, m):
    return ((x + m - 1) // m) * m


def _intake_machine_kernel(state_ref, pat_ref, care_ref, out_ref, *, slot_channels):
    """One batch tile.

    state_ref : (C, TB) int32   -- FSM state, channels on sublanes, batch on lanes
    pat_ref   : (N, S)  int32   -- per-state pattern value for each kept (trigger, channel) slot
    care_ref  : (N, S)  int32   -- 0 = don't care, -1 = must match (bit mask)
    out_ref   : (1, TB) int32   -- packed: low 16 bits = index, high bits = match count
    """
    pat = pat_ref[...]                            # (N, S)
    care = care_ref[...]                          # (N, S) 0 / -1
    num_states = pat.shape[0]
    tb = state_ref.shape[1]

    # Hoist + dedupe state-channel loads (same channel may feed several triggers).
    rows = {c: state_ref[c:c + 1, :] for c in dict.fromkeys(slot_channels)}  # (1, TB) each

    # Integer mismatch accumulator: nonzero where any cared channel differs.
    bad = None                                    # (N, TB) int32
    for s, c in enumerate(slot_channels):         # S is a small, static slot count
        row = rows[c]                             # (1, TB) lane-dense state channel
        term = (row ^ pat[:, s:s + 1]) & care[:, s:s + 1]     # (N, TB) pure VPU int ops
        bad = term if bad is None else (bad | term)

    # Single fused sublane reduction: packed = count<<16 | sum(matching indexes).
    # Under the module's "exactly one match" contract the low bits are the
    # triggered index; the high bits let the host detect 0/multi-match.
    n_iota = jax.lax.broadcasted_iota(jnp.int32, (num_states, tb), 0)  # (N, TB)
    packed = jnp.sum(jnp.where(bad == 0, n_iota + jnp.int32(1 << 16), jnp.int32(0)),
                     axis=0, keepdims=True)                            # (1, TB)
    out_ref[...] = packed


@functools.partial(jax.jit, static_argnames=("slot_channels", "b_pad", "tb"))
def _intake_machine_call(state, pat_slots, care_slots, *, slot_channels, b_pad, tb):
    """Jitted body: layout plumbing + pallas_call + unpack fused in one XLA program."""
    C = state.shape[-1]
    batch_shape = state.shape[:-1]
    B = int(np.prod(batch_shape, dtype=np.int64)) if batch_shape else 1
    N, S = pat_slots.shape

    # TODO(synk): int64 CBTensor channel values outside int32 range would truncate here.
    state2 = jnp.asarray(state, dtype=jnp.int32).reshape(B, C)
    state_t = jnp.pad(jnp.transpose(state2), ((0, 0), (0, b_pad - B)))   # (C, B_pad), one fused copy

    kernel = functools.partial(_intake_machine_kernel, slot_channels=slot_channels)

    packed = pl.pallas_call(
        kernel,
        grid=(b_pad // tb,),
        in_specs=[
            pl.BlockSpec((C, tb), lambda i: (0, i)),           # pipelined batch tile
            pl.BlockSpec((N, S), lambda i: (0, 0)),            # patterns (resident, tiny)
            pl.BlockSpec((N, S), lambda i: (0, 0)),            # care bits (resident, tiny)
        ],
        out_specs=pl.BlockSpec((1, tb), lambda i: (0, i)),     # single lane-dense packed row
        out_shape=jax.ShapeDtypeStruct((1, b_pad), jnp.int32),
        compiler_params=pltpu.CompilerParams(
            dimension_semantics=("parallel",),                 # shard batch tiles across TCs
            vmem_limit_bytes=32 * 1024 * 1024,                 # ample; working set ~ few MiB
        ),
    )(state_t, pat_slots, care_slots)

    flat = packed[0, :B]
    indexes = (flat & jnp.int32(0xFFFF)).reshape(batch_shape)
    counts = (flat >> 16).reshape(batch_shape)
    return indexes, counts


def intake_machine_forward(state, patterns, care, *, batch_tile=16384):
    """state: (..., C) int jax array; patterns/care: (H, N, C) static host arrays.

    Returns (indexes, counts), each of shape (...). The caller must validate
    counts == 1 (mirrors the ValueError raised by the PyTorch module).
    """
    patterns = np.asarray(patterns, dtype=np.int32)
    care = np.asarray(care, dtype=np.int32)
    H, N, C = patterns.shape
    assert state.shape[-1] == C
    assert N < (1 << 15), "packed index/count encoding assumes fewer than 32768 FSM states"

    batch_shape = state.shape[:-1]
    B = int(np.prod(batch_shape, dtype=np.int64)) if batch_shape else 1

    # --- static host-side preprocessing (trace time) -------------------------
    # Flatten (trigger, channel) slots and prune those no state cares about.
    slots = [(h, c) for h in range(H) for c in range(C) if care[h, :, c].any()]
    if not slots:                                  # degenerate: everything matches
        slots = [(0, 0)]                           # single all-don't-care slot
    slot_channels = tuple(int(c) for _, c in slots)
    pat_slots = np.stack([patterns[h, :, c] for h, c in slots], axis=1)            # (N, S)
    care_slots = np.stack([np.where(care[h, :, c] != 0, -1, 0) for h, c in slots],
                          axis=1).astype(np.int32)                                 # (N, S) 0/-1

    # --- batch tiling: big lane-dense tiles, but keep >= 2 tiles for megacore --
    b_pad = _round_up(max(B, 1), 128)
    tb = min(_round_up(batch_tile, 128), b_pad)
    half = _round_up(-(-b_pad // 2), 128)
    if b_pad >= 256 and tb > half:
        tb = half                                  # ensure both v7x TensorCores get work
    b_pad = _round_up(b_pad, tb)

    return _intake_machine_call(
        state, jnp.asarray(pat_slots), jnp.asarray(care_slots),
        slot_channels=slot_channels, b_pad=b_pad, tb=tb)


def intake_machine_reference(state, patterns, care):
    """Pure-JAX mirror of IntakeMachine.forward for verification."""
    patterns = jnp.asarray(patterns)
    care = jnp.asarray(care)
    H, N, _ = patterns.shape
    actions_mask = jnp.full(state.shape[:-1] + (N,), True)
    for h in range(H):
        eq = (state[..., None, :] == patterns[h]) | (care[h] == 0)   # (..., N, C)
        actions_mask = jnp.logical_and(jnp.all(eq, axis=-1), actions_mask)
    counts = actions_mask.sum(axis=-1)
    indexes = jnp.argmax(actions_mask, axis=-1).astype(jnp.int32)
    return indexes, counts


if __name__ == "__main__":
    key = jax.random.PRNGKey(0)
    k_mode, k_noise = jax.random.split(key)

    # Small shapes: batch=(2, 8) elements, C=8 CB channels, N=8 FSM states, H=2 triggers.
    batch_shape = (2, 8)
    C, N, H = 8, 8, 2

    # Deterministic "registered operator" parameters:
    #  trigger 0: cares about channel 0, requires channel0 == n
    #  trigger 1: cares about channel 1, requires channel1 == n % 3
    patterns = np.zeros((H, N, C), dtype=np.int32)
    care = np.zeros((H, N, C), dtype=np.int32)
    for n in range(N):
        patterns[0, n, 0] = n
        care[0, n, 0] = 1
        patterns[1, n, 1] = n % 3
        care[1, n, 1] = 1

    # Deterministic FSM state tensor: channel 0 = mode, channel 1 = mode % 3,
    # remaining channels are don't-care noise. Guarantees exactly one trigger per element.
    modes = jax.random.randint(k_mode, batch_shape, 0, N, dtype=jnp.int32)
    noise = jax.random.randint(k_noise, batch_shape + (C,), 0, 100, dtype=jnp.int32)
    state = noise.at[..., 0].set(modes).at[..., 1].set(modes % 3)

    idx, cnt = intake_machine_forward(state, patterns, care)
    idx = jax.block_until_ready(idx)
    cnt = jax.block_until_ready(cnt)

    # Host-side validation, mirroring the ValueError in the PyTorch forward.
    # TODO(synk): an in-kernel raise has no Pallas equivalent; the count output covers it.
    assert bool(jnp.all(cnt == 1)), "Some values never had a triggered state, or had multiple"

    ref_idx, ref_cnt = intake_machine_reference(state, patterns, care)
    assert bool(jnp.all(ref_cnt == 1))
    assert bool(jnp.all(idx == ref_idx))
    assert bool(jnp.all(idx == modes))

    print("KERNEL_OK")
</pallas_src>

<mosaic_0001>
module attributes {stable_mosaic.version = 11 : i64} {
  func.func @_intake_machine_kernel(%arg0: i32, %arg1: memref<8x128xi32, #tpu.memory_space<vmem>>, %arg2: memref<8x2xi32, #tpu.memory_space<vmem>>, %arg3: memref<8x2xi32, #tpu.memory_space<vmem>>, %arg4: memref<1x128xi32, #tpu.memory_space<vmem>>) attributes {dimension_semantics = [#tpu.dimension_semantics<parallel>], iteration_bounds = array<i64: 1>, scalar_prefetch = 0 : i64, scratch_operands = 0 : i64, tpu.core_type = #tpu.core_type<tc>, window_params = [{transform_indices = @transform_0, window_bounds = array<i64: 8, 128>}, {pipeline_mode = #tpu.pipeline_mode<synchronous>, transform_indices = @transform_1, window_bounds = array<i64: 8, 2>}, {pipeline_mode = #tpu.pipeline_mode<synchronous>, transform_indices = @transform_2, window_bounds = array<i64: 8, 2>}, {transform_indices = @transform_3, window_bounds = array<i64: 1, 128>}]} {
    %c0 = arith.constant 0 : index
    %c0_0 = arith.constant 0 : index
    %0 = vector.load %arg2[%c0, %c0_0] : memref<8x2xi32, #tpu.memory_space<vmem>>, vector<8x2xi32>
    %c0_1 = arith.constant 0 : index
    %c0_2 = arith.constant 0 : index
    %1 = vector.load %arg3[%c0_1, %c0_2] : memref<8x2xi32, #tpu.memory_space<vmem>>, vector<8x2xi32>
    %c0_3 = arith.constant 0 : index
    %c0_4 = arith.constant 0 : index
    %2 = vector.load %arg1[%c0_3, %c0_4] : memref<8x128xi32, #tpu.memory_space<vmem>>, vector<1x128xi32>
    %c1 = arith.constant 1 : index
    %c0_5 = arith.constant 0 : index
    %3 = vector.load %arg1[%c1, %c0_5] : memref<8x128xi32, #tpu.memory_space<vmem>>, vector<1x128xi32>
    %4 = vector.extract_strided_slice %0 {offsets = [0, 0], sizes = [8, 1], strides = [1, 1]} : vector<8x2xi32> to vector<8x1xi32>
    %5 = vector.broadcast %2 : vector<1x128xi32> to vector<8x128xi32>
    %6 = vector.broadcast %4 : vector<8x1xi32> to vector<8x128xi32>
    %7 = arith.xori %5, %6 : vector<8x128xi32>
    %8 = vector.extract_strided_slice %1 {offsets = [0, 0], sizes = [8, 1], strides = [1, 1]} : vector<8x2xi32> to vector<8x1xi32>
    %9 = vector.broadcast %8 : vector<8x1xi32> to vector<8x128xi32>
    %10 = arith.andi %7, %9 : vector<8x128xi32>
    %11 = vector.extract_strided_slice %0 {offsets = [0, 1], sizes = [8, 1], strides = [1, 1]} : vector<8x2xi32> to vector<8x1xi32>
    %12 = vector.broadcast %3 : vector<1x128xi32> to vector<8x128xi32>
    %13 = vector.broadcast %11 : vector<8x1xi32> to vector<8x128xi32>
    %14 = arith.xori %12, %13 : vector<8x128xi32>
    %15 = vector.extract_strided_slice %1 {offsets = [0, 1], sizes = [8, 1], strides = [1, 1]} : vector<8x2xi32> to vector<8x1xi32>
    %16 = vector.broadcast %15 : vector<8x1xi32> to vector<8x128xi32>
    %17 = arith.andi %14, %16 : vector<8x128xi32>
    %18 = arith.ori %10, %17 : vector<8x128xi32>
    %19 = tpu.iota {dimensions = array<i32: 0>} : vector<8x128xi32>
    %c0_i32 = arith.constant 0 : i32
    %20 = vector.broadcast %c0_i32 : i32 to vector<8x128xi32>
    %21 = arith.cmpi eq, %18, %20 : vector<8x128xi32>
    %c65536_i32 = arith.constant 65536 : i32
    %22 = vector.broadcast %c65536_i32 : i32 to vector<8x128xi32>
    %23 = arith.addi %19, %22 : vector<8x128xi32>
    %c0_i32_6 = arith.constant 0 : i32
    %24 = vector.broadcast %c0_i32_6 : i32 to vector<8x128xi32>
    %25 = arith.select %21, %23, %24 : vector<8x128xi1>, vector<8x128xi32>
    %cst = arith.constant dense<0> : vector<128xi32>
    %26 = vector.multi_reduction <add>, %25, %cst [0] : vector<8x128xi32> to vector<128xi32>
    %27 = vector.shape_cast %26 : vector<128xi32> to vector<1x128xi32>
    %c0_7 = arith.constant 0 : index
    %c0_8 = arith.constant 0 : index
    %28 = vector.load %arg4[%c0_7, %c0_8] : memref<1x128xi32, #tpu.memory_space<vmem>>, vector<1x128xi32>
    tpu.vector_store %arg4[%c0_7, %c0_8], %27 {strides = array<i32>} : memref<1x128xi32, #tpu.memory_space<vmem>>, vector<1x128xi32>,
    return
  }
  func.func @transform_0(%arg0: i32) -> (i32, i32) {
    %c0_i32 = arith.constant 0 : i32
    %c0_i32_0 = arith.constant 0 : i32
    return %c0_i32, %arg0 : i32, i32
  }
  func.func @transform_1(%arg0: i32) -> (i32, i32) {
    %c0_i32 = arith.constant 0 : i32
    %c0_i32_0 = arith.constant 0 : i32
    %c0_i32_1 = arith.constant 0 : i32
    return %c0_i32, %c0_i32_0 : i32, i32
  }
  func.func @transform_2(%arg0: i32) -> (i32, i32) {
    %c0_i32 = arith.constant 0 : i32
    %c0_i32_0 = arith.constant 0 : i32
    %c0_i32_1 = arith.constant 0 : i32
    return %c0_i32, %c0_i32_0 : i32, i32
  }
  func.func @transform_3(%arg0: i32) -> (i32, i32) {
    %c0_i32 = arith.constant 0 : i32
    %c0_i32_0 = arith.constant 0 : i32
    return %c0_i32, %arg0 : i32, i32
  }
}

</mosaic_0001>

<bundles_post_ra>
// kernel: _intake_machine_call.1
= control target key start
LH: loop header
LB: loop body
LE: loop exit
PB: predicated region body
PF: predicated region fallthrough
CT: control target
= control target key end

     0   :  { %v61_v0 = vmov 0   ;;  %v62_v3 = vmov 1   ;;  %v37_v7 = vlaneseq  ;;  %s98_s1 = inlined_call_operand.vmem [shape: s32[8,2], index: 1, kind: input, shape index: {}]   ;;  %s99_s2 = inlined_call_operand.vmem [shape: s32[8,2], index: 2, kind: input, shape index: {}]   ;;  %s100_s0 = inlined_call_operand.vmem [shape: s32[8,128], index: 0, kind: input, shape index: {}]   ;;  %s101_s3 = inlined_call_operand.vmem [shape: s32[1,128], index: 3, kind: output, shape index: {}]  }
   0x1   :  { %55 = vset.pattern.permute.xlu0 %v61_v0  ;;  %v14_v1 = vld [vmem:[%s98_s1] sm:$0xff]  ;;  %57 = vset.pattern.permute.xlu1 %v61_v0 }
   0x2   :  { %v15_v2 = vld [vmem:[%s99_s2] sm:$0xff]  ;;  %20 = vperm.xlu0 %55, %v14_v1   ;;  %v38_v11 = vshrl.u32 %v37_v7, 7 }
   0x3   :  { %24 = vperm.xlu1 %57, %v15_v2   ;;  %v59_v6 = vld [vmem:[%s100_s0] ss:$0 sm:$0xff]  ;;  %v60_v8 = vld [vmem:[%s100_s0 + $0x1] ss:$0 sm:$0xff] }
   0x4   :  { %v40_v16 = vadd.s32 65536, %v38_v11 }
   0xa   :  { %56 = vset.pattern.permute.xlu0 %v62_v3 }
   0xb   :  { %58 = vset.pattern.permute.xlu1 %v62_v3  ;;  %29 = vperm.xlu0 %56, %v14_v1  }
   0xc   :  { %33 = vperm.xlu1 %58, %v15_v2  }
  0x74   :  { %v21_v4 = vpop.permute.xlu0 %20 }
  0x75   :  { %v25_v5 = vpop.permute.xlu1 %24  ;;  %v22_v9 = vxor.u32 %v59_v6, %v21_v4 }
  0x77   :  { %v26_v14 = vand.u32 %v25_v5, %v22_v9 }
  0x7d   :  { %v30_v10 = vpop.permute.xlu0 %29 }
  0x7e   :  { %v34_v12 = vpop.permute.xlu1 %33  ;;  %v31_v13 = vxor.u32 %v60_v8, %v30_v10 }
  0x80   :  { %v35_v15 = vand.u32 %v34_v12, %v31_v13 }
  0x82   :  { %v36_v17 = vor.u32 %v35_v15, %v26_v14 }
  0x84   :  { %vm39_vm0 = vcmp.eq.s32.totalorder %v36_v17, 0 }
  0x85   :  { %v41_v18 = vsel %vm39_vm0, %v40_v16, 0 }
  0x86   :  { %v42_v19 = vrot.slane %v41_v18, 4 }
  0x88   :  { %v43_v20 = vadd.s32 %v42_v19, %v41_v18 }
  0x8a   :  { %v44_v21 = vrot.slane %v43_v20, 2 }
  0x8c   :  { %v45_v22 = vadd.s32 %v44_v21, %v43_v20 }
  0x8e   :  { %v46_v23 = vrot.slane %v45_v22, 1 }
  0x90   :  { %v47_v24 = vadd.s32 %v46_v23, %v45_v22 }
  0x92   :  { %48 = vst [vmem:[%s101_s3] sm:$0x1] %v47_v24 }

</bundles_post_ra>
